<compile_context>
chip_gen: v6e
topology: v6e:2x2x1
jax: 0.10.0
libtpu: 0.0.40
codegen_flags: <defaults>
</compile_context>

<pallas_src>
import jax
import jax.numpy as jnp
from jax.experimental import pallas as pl
from jax.experimental.pallas import tpu as pltpu

EPS = 1e-3                       # BatchNorm2d eps of the module
_VMEM_LIMIT = 32 * 1024 * 1024   # explicit scoped-VMEM limit for both pallas_calls


def _round_up(a, b):
    return (a + b - 1) // b * b


def _pick_tile(hw, tm_max):
    """Pick a lane-dense pixel tile (multiple of 128, <= tm_max).

    Pads hw up to a multiple of the tile instead of requiring divisibility, trading a
    little zero-pad waste for large tiles (DMA efficiency saturates around ~1024
    lanes; small tiles cost ~0.35us/grid-step overhead).
    """
    hwp128 = _round_up(hw, 128)
    best_tm, best_key = 128, (-1.0, 0)
    for cand in range(128, min(tm_max, hwp128) + 1, 128):
        padded = _round_up(hw, cand)
        eff = (hw / padded) * min(1.0, cand / 1024.0)
        key = (eff, cand)
        if key > best_key:
            best_key, best_tm = key, cand
    return best_tm, _round_up(hw, best_tm)


def _bn_stats_kernel(x_ref, w1_ref, sum_ref, sumsq_ref):
    # x_ref: (C, TM) pixels-on-lanes; w1_ref: (C, C) as (Cout, Cin).
    # sum_ref / sumsq_ref: (C, 1) PER-BATCH partial accumulators, resident across the
    # pixel-tile axis (output block index depends only on the batch grid index).
    @pl.when(pl.program_id(1) == 0)
    def _():
        sum_ref[...] = jnp.zeros_like(sum_ref)
        sumsq_ref[...] = jnp.zeros_like(sumsq_ref)

    y = jnp.dot(w1_ref[...], x_ref[...], preferred_element_type=jnp.float32)  # (C, TM)
    sum_ref[...] += jnp.sum(y, axis=1, keepdims=True)
    sumsq_ref[...] += jnp.sum(y * y, axis=1, keepdims=True)


def _apply_kernel(x_ref, x3_ref, wx_ref, wr_ref, b2_ref, out_ref):
    # Folded phase 2: out = Wx @ x + Wr @ x3 + b2   (Wx = W2*diag(scale)*W1, Wr = W2,
    # b2 = W2 @ bias).  Two accumulated MXU dots + one lane-broadcast bias add.
    acc = jnp.dot(wx_ref[...], x_ref[...], preferred_element_type=jnp.float32)   # (Cout, TM)
    acc = acc + jnp.dot(wr_ref[...], x3_ref[...], preferred_element_type=jnp.float32)
    out_ref[...] = acc + b2_ref[...]


def fused_forward(x10, x3, w1_oihw, gamma, beta, w2_oihw, *, tm_max=8192):
    """x10, x3: (N, C, H, W) float32.  w*_oihw: PyTorch conv weights (O, I, 1, 1)."""
    N, C, H, W = x10.shape
    Cout = w2_oihw.shape[0]
    HW = H * W
    M_true = N * HW  # true element count for the BN batch statistics

    tm, HWp = _pick_tile(HW, tm_max)
    num_t = HWp // tm
    grid = (N, num_t)

    # NCHW is already (channels, pixels) per batch element: no transposes needed.
    x = x10.reshape(N, C, HW)
    x3f = x3.reshape(N, C, HW)
    if HWp != HW:
        pad = HWp - HW
        # Zero padding contributes 0 to sum / sum-of-squares; we divide by M_true.
        x = jnp.pad(x, ((0, 0), (0, 0), (0, pad)))
        x3f = jnp.pad(x3f, ((0, 0), (0, 0), (0, pad)))

    # (O, I, 1, 1) -> (O, I): 1x1 conv == W @ x with channels on sublanes.
    w1 = w1_oihw[:, :, 0, 0].astype(jnp.float32)   # (C, C)
    w2 = w2_oihw[:, :, 0, 0].astype(jnp.float32)   # (Cout, C)

    # ---- phase 1: per-batch partial sum / sum-of-squares of y = W1 @ X ------------
    stats_flops = int(2 * N * HWp * C * C + 3 * N * HWp * C)
    stats_bytes = int(4 * (N * HWp * C + C * C + 2 * N * C))
    sums, sumsqs = pl.pallas_call(
        _bn_stats_kernel,
        out_shape=(jax.ShapeDtypeStruct((N, C, 1), jnp.float32),
                   jax.ShapeDtypeStruct((N, C, 1), jnp.float32)),
        grid=grid,
        in_specs=[
            pl.BlockSpec((None, C, tm), lambda n, t: (n, 0, t)),
            pl.BlockSpec((C, C), lambda n, t: (0, 0)),
        ],
        out_specs=(
            pl.BlockSpec((None, C, 1), lambda n, t: (n, 0, 0)),
            pl.BlockSpec((None, C, 1), lambda n, t: (n, 0, 0)),
        ),
        compiler_params=pltpu.CompilerParams(
            dimension_semantics=("parallel", "arbitrary"),
            vmem_limit_bytes=_VMEM_LIMIT),
        cost_estimate=pl.CostEstimate(
            flops=stats_flops, transcendentals=0, bytes_accessed=stats_bytes),
    )(x, w1)

    # ---- fold BN (training-mode batch stats, biased var) + both convs --------------
    sum_y = jnp.sum(sums, axis=0)                                 # (C, 1)
    sumsq_y = jnp.sum(sumsqs, axis=0)                             # (C, 1)
    mean = sum_y / M_true
    var = jnp.maximum(sumsq_y / M_true - mean * mean, 0.0)
    scale = gamma.reshape(C, 1) * jax.lax.rsqrt(var + EPS)        # (C, 1)
    bias = beta.reshape(C, 1) - mean * scale                      # (C, 1)

    wx = w2 @ (scale * w1)                                        # (Cout, C)  = W2 diag(scale) W1
    wr = w2                                                       # (Cout, C)
    b2 = w2 @ bias                                                # (Cout, 1)

    # ---- phase 2: single folded matmul (+bias) over the stacked [x; x3] ------------
    apply_flops = int(2 * N * HWp * (2 * C) * Cout + N * HWp * Cout)
    apply_bytes = int(4 * (2 * N * HWp * C + N * HWp * Cout + 2 * Cout * C + Cout))
    out = pl.pallas_call(
        _apply_kernel,
        out_shape=jax.ShapeDtypeStruct((N, Cout, HWp), jnp.float32),
        grid=grid,
        in_specs=[
            pl.BlockSpec((None, C, tm), lambda n, t: (n, 0, t)),
            pl.BlockSpec((None, C, tm), lambda n, t: (n, 0, t)),
            pl.BlockSpec((Cout, C), lambda n, t: (0, 0)),
            pl.BlockSpec((Cout, C), lambda n, t: (0, 0)),
            pl.BlockSpec((Cout, 1), lambda n, t: (0, 0)),
        ],
        out_specs=pl.BlockSpec((None, Cout, tm), lambda n, t: (n, 0, t)),
        compiler_params=pltpu.CompilerParams(
            dimension_semantics=("parallel", "parallel"),
            vmem_limit_bytes=_VMEM_LIMIT),
        cost_estimate=pl.CostEstimate(
            flops=apply_flops, transcendentals=0, bytes_accessed=apply_bytes),
    )(x, x3f, wx, wr, b2)

    if HWp != HW:
        out = out[:, :, :HW]
    return out.reshape(N, Cout, H, W)


def _reference(x10, x3, w1_oihw, gamma, beta, w2_oihw):
    # Pure-JAX reference (BatchNorm in training mode, batch statistics, biased var).
    y = jnp.einsum("nchw,oc->nohw", x10, w1_oihw[:, :, 0, 0])
    mean = jnp.mean(y, axis=(0, 2, 3), keepdims=True)
    var = jnp.mean(jnp.square(y - mean), axis=(0, 2, 3), keepdims=True)
    y_hat = (y - mean) * jax.lax.rsqrt(var + EPS)
    z = y_hat * gamma.reshape(1, -1, 1, 1) + beta.reshape(1, -1, 1, 1) + x3
    return jnp.einsum("nchw,oc->nohw", z, w2_oihw[:, :, 0, 0])


if __name__ == "__main__":
    # Small shapes consistent with the module (channels fixed at 16 -> 16 -> 96).
    N, C, H, W = 2, 16, 16, 16
    COUT = 96

    key = jax.random.PRNGKey(0)
    k_x, k_r, k_w1, k_w2, k_g, k_b = jax.random.split(key, 6)

    x10 = jax.random.normal(k_x, (N, C, H, W), dtype=jnp.float32)
    x3 = jax.random.normal(k_r, (N, C, H, W), dtype=jnp.float32)

    # Deterministic synthetic parameters (conv weights OIHW, BN affine params).
    w1 = 0.2 * jax.random.normal(k_w1, (C, C, 1, 1), dtype=jnp.float32)
    w2 = 0.2 * jax.random.normal(k_w2, (COUT, C, 1, 1), dtype=jnp.float32)
    gamma = 1.0 + 0.1 * jax.random.normal(k_g, (C,), dtype=jnp.float32)
    beta = 0.1 * jax.random.normal(k_b, (C,), dtype=jnp.float32)

    out = fused_forward(x10, x3, w1, gamma, beta, w2)
    out = jax.block_until_ready(out)

    ref = _reference(x10, x3, w1, gamma, beta, w2)
    assert out.shape == (N, COUT, H, W), out.shape
    assert jnp.allclose(out, ref, atol=3e-4, rtol=3e-4), "mismatch vs reference"

    # TODO(synk): BatchNorm is implemented in training mode (batch statistics); the
    # running_mean/running_var buffer update of the PyTorch module is not emitted.
    print("KERNEL_OK")
</pallas_src>

<mosaic_0001>
module attributes {stable_mosaic.version = 11 : i64} {
  func.func @_bn_stats_kernel(%arg0: i32, %arg1: i32, %arg2: memref<1x16x256xf32, #tpu.memory_space<vmem>>, %arg3: memref<16x16xf32, #tpu.memory_space<vmem>>, %arg4: memref<1x16x1xf32, #tpu.memory_space<vmem>>, %arg5: memref<1x16x1xf32, #tpu.memory_space<vmem>>) attributes {dimension_semantics = [#tpu.dimension_semantics<parallel>, #tpu.dimension_semantics<arbitrary>], iteration_bounds = array<i64: 2, 1>, scalar_prefetch = 0 : i64, scratch_operands = 0 : i64, tpu.core_type = #tpu.core_type<tc>, window_params = [{transform_indices = @transform_0, window_bounds = array<i64: 1, 16, 256>}, {pipeline_mode = #tpu.pipeline_mode<synchronous>, transform_indices = @transform_1, window_bounds = array<i64: 16, 16>}, {transform_indices = @transform_2, window_bounds = array<i64: 1, 16, 1>}, {transform_indices = @transform_3, window_bounds = array<i64: 1, 16, 1>}]} {
    %c0_i32 = arith.constant 0 : i32
    %0 = arith.cmpi eq, %arg1, %c0_i32 : i32
    %1 = arith.extui %0 : i1 to i32
    %c0_i32_0 = arith.constant 0 : i32
    %2 = arith.cmpi ne, %1, %c0_i32_0 : i32
    scf.if %2 {
      %cst_19 = arith.constant 0.000000e+00 : f32
      %24 = vector.broadcast %cst_19 : f32 to vector<16x1xf32>
      %c0_20 = arith.constant 0 : index
      %c0_21 = arith.constant 0 : index
      %c0_22 = arith.constant 0 : index
      %25 = vector.load %arg4[%c0_20, %c0_21, %c0_22] : memref<1x16x1xf32, #tpu.memory_space<vmem>>, vector<1x16x1xf32>
      %26 = vector.shape_cast %25 : vector<1x16x1xf32> to vector<16x1xf32>
      %27 = vector.shape_cast %24 : vector<16x1xf32> to vector<1x16x1xf32>
      tpu.vector_store %arg4[%c0_20, %c0_21, %c0_22], %27 {strides = array<i32>} : memref<1x16x1xf32, #tpu.memory_space<vmem>>, vector<1x16x1xf32>,
      %cst_23 = arith.constant 0.000000e+00 : f32
      %28 = vector.broadcast %cst_23 : f32 to vector<16x1xf32>
      %c0_24 = arith.constant 0 : index
      %c0_25 = arith.constant 0 : index
      %c0_26 = arith.constant 0 : index
      %29 = vector.load %arg5[%c0_24, %c0_25, %c0_26] : memref<1x16x1xf32, #tpu.memory_space<vmem>>, vector<1x16x1xf32>
      %30 = vector.shape_cast %29 : vector<1x16x1xf32> to vector<16x1xf32>
      %31 = vector.shape_cast %28 : vector<16x1xf32> to vector<1x16x1xf32>
      tpu.vector_store %arg5[%c0_24, %c0_25, %c0_26], %31 {strides = array<i32>} : memref<1x16x1xf32, #tpu.memory_space<vmem>>, vector<1x16x1xf32>,
    } else {
    }
    %c0 = arith.constant 0 : index
    %c0_1 = arith.constant 0 : index
    %3 = vector.load %arg3[%c0, %c0_1] : memref<16x16xf32, #tpu.memory_space<vmem>>, vector<16x16xf32>
    %c0_2 = arith.constant 0 : index
    %c0_3 = arith.constant 0 : index
    %c0_4 = arith.constant 0 : index
    %4 = vector.load %arg2[%c0_2, %c0_3, %c0_4] : memref<1x16x256xf32, #tpu.memory_space<vmem>>, vector<1x16x256xf32>
    %5 = vector.shape_cast %4 : vector<1x16x256xf32> to vector<16x256xf32>
    %cst = arith.constant dense<0.000000e+00> : vector<16x256xf32>
    %6 = tpu.matmul %3, %5, %cst {dimension_numbers = #tpu.dot_dimension_numbers<[1], [0], [0], [1], [0, 0, 1, 1], [], []>} : vector<16x16xf32>, vector<16x256xf32>, vector<16x256xf32> -> vector<16x256xf32>
    %c0_5 = arith.constant 0 : index
    %c0_6 = arith.constant 0 : index
    %c0_7 = arith.constant 0 : index
    %7 = vector.load %arg4[%c0_5, %c0_6, %c0_7] : memref<1x16x1xf32, #tpu.memory_space<vmem>>, vector<1x16x1xf32>
    %8 = vector.shape_cast %7 : vector<1x16x1xf32> to vector<16x1xf32>
    %cst_8 = arith.constant dense<0.000000e+00> : vector<16xf32>
    %9 = vector.multi_reduction <add>, %6, %cst_8 [1] : vector<16x256xf32> to vector<16xf32>
    %10 = vector.shape_cast %9 : vector<16xf32> to vector<16x1xf32>
    %11 = arith.addf %8, %10 : vector<16x1xf32>
    %c0_9 = arith.constant 0 : index
    %c0_10 = arith.constant 0 : index
    %c0_11 = arith.constant 0 : index
    %12 = vector.load %arg4[%c0_9, %c0_10, %c0_11] : memref<1x16x1xf32, #tpu.memory_space<vmem>>, vector<1x16x1xf32>
    %13 = vector.shape_cast %12 : vector<1x16x1xf32> to vector<16x1xf32>
    %14 = vector.shape_cast %11 : vector<16x1xf32> to vector<1x16x1xf32>
    tpu.vector_store %arg4[%c0_9, %c0_10, %c0_11], %14 {strides = array<i32>} : memref<1x16x1xf32, #tpu.memory_space<vmem>>, vector<1x16x1xf32>,
    %c0_12 = arith.constant 0 : index
    %c0_13 = arith.constant 0 : index
    %c0_14 = arith.constant 0 : index
    %15 = vector.load %arg5[%c0_12, %c0_13, %c0_14] : memref<1x16x1xf32, #tpu.memory_space<vmem>>, vector<1x16x1xf32>
    %16 = vector.shape_cast %15 : vector<1x16x1xf32> to vector<16x1xf32>
    %17 = arith.mulf %6, %6 : vector<16x256xf32>
    %cst_15 = arith.constant dense<0.000000e+00> : vector<16xf32>
    %18 = vector.multi_reduction <add>, %17, %cst_15 [1] : vector<16x256xf32> to vector<16xf32>
    %19 = vector.shape_cast %18 : vector<16xf32> to vector<16x1xf32>
    %20 = arith.addf %16, %19 : vector<16x1xf32>
    %c0_16 = arith.constant 0 : index
    %c0_17 = arith.constant 0 : index
    %c0_18 = arith.constant 0 : index
    %21 = vector.load %arg5[%c0_16, %c0_17, %c0_18] : memref<1x16x1xf32, #tpu.memory_space<vmem>>, vector<1x16x1xf32>
    %22 = vector.shape_cast %21 : vector<1x16x1xf32> to vector<16x1xf32>
    %23 = vector.shape_cast %20 : vector<16x1xf32> to vector<1x16x1xf32>
    tpu.vector_store %arg5[%c0_16, %c0_17, %c0_18], %23 {strides = array<i32>} : memref<1x16x1xf32, #tpu.memory_space<vmem>>, vector<1x16x1xf32>,
    return
  }
  func.func @transform_0(%arg0: i32, %arg1: i32) -> (i32, i32, i32) {
    %c0_i32 = arith.constant 0 : i32
    %c0_i32_0 = arith.constant 0 : i32
    return %arg0, %c0_i32, %arg1 : i32, i32, i32
  }
  func.func @transform_1(%arg0: i32, %arg1: i32) -> (i32, i32) {
    %c0_i32 = arith.constant 0 : i32
    %c0_i32_0 = arith.constant 0 : i32
    %c0_i32_1 = arith.constant 0 : i32
    return %c0_i32, %c0_i32_0 : i32, i32
  }
  func.func @transform_2(%arg0: i32, %arg1: i32) -> (i32, i32, i32) {
    %c0_i32 = arith.constant 0 : i32
    %c0_i32_0 = arith.constant 0 : i32
    %c0_i32_1 = arith.constant 0 : i32
    return %arg0, %c0_i32, %c0_i32_0 : i32, i32, i32
  }
  func.func @transform_3(%arg0: i32, %arg1: i32) -> (i32, i32, i32) {
    %c0_i32 = arith.constant 0 : i32
    %c0_i32_0 = arith.constant 0 : i32
    %c0_i32_1 = arith.constant 0 : i32
    return %arg0, %c0_i32, %c0_i32_0 : i32, i32, i32
  }
}

</mosaic_0001>

<bundles_post_ra>
// kernel: tpu_custom_call.1
= control target key start
LH: loop header
LB: loop body
LE: loop exit
PB: predicated region body
PF: predicated region fallthrough
CT: control target
= control target key end

     0   :  { %9 = vsyncpa [#allocation3], 0  ;;  %s859_s0 = inlined_call_operand.hbm [shape: f32[2,16,256], index: 0, kind: input, shape index: {}]   ;;  %s860_s1 = inlined_call_operand.hbm [shape: f32[16,16], index: 1, kind: input, shape index: {}]   ;;  %s861_s2 = inlined_call_operand.vmem [shape: f32[2,16,1], index: 2, kind: output, shape index: {0}]   ;;  %s862_s3 = inlined_call_operand.vmem [shape: f32[2,16,1], index: 3, kind: output, shape index: {1}]  }
   0x1   :  { %11 = vsyncpa [#allocation3 + $0x1], 0 }
   0x2   :  { %12 = vsyncpa [#allocation5], 0  ;;  %s719_s12 = smov 0   ;;  %s721_s13 = smov 0  }
   0x3   :  { %s723_s14 = smov 0   ;;  %s725_s15 = smov 0  }
   0x4   :  { %s727_s16 = smov 0   ;;  %s729_s17 = smov 0  }
   0x5 LB: > { %s485_s18 = sadd.s32 4294967295, %s690_s17   ;;  %p52_p0 = scmp.ne.s32.totalorder %s674_s13, %s670_s12  ;;  %s690_s17 = sphi %s729_s17, %s18_s17   ;;  %s686_s16 = sphi %s727_s16, %s872_s16   ;;  %s682_s15 = sphi %s725_s15, %s871_s15   ;;  %s678_s14 = sphi %s723_s14, %s870_s14   ;;  %s674_s13 = sphi %s721_s13, %s869_s13   ;;  %s670_s12 = sphi %s719_s12, %s868_s12  }
   0x6   : > { %p749_p1 = scmp.eq.s32.totalorder %s485_s18, 0  ;;  %p487_p2 = scmp.ge.s32.totalorder %s690_s17, 1 }
   0x7   : > { %p136_p3 = scmp.lt.s32.totalorder %s690_s17, 3  ;;  %s692_s22 = smov [#allocation4]  }
   0x8   : > { %p757_p4 = por %p749_p1, %p52_p0  ;;  %s148_s23 = sshll.u32 %s692_s22, 4  ;;  %s149_s23 = int_to_ptr.vmem [resolvable:$true] %s148_s23 }
   0x9   : > { %p761_p5 = pnand %p487_p2, %p136_p3  ;;  %s30_s25 = sadd.s32 1, %s686_s16 }
   0xa   : > { %s593_s26 = scalar_lea.vmem %s149_s23, 256  ;;  %p601_p12 = scmp.lt.s32.totalorder %s149_s23, %s149_s23 }
   0xb   : > { %p517_p6 = pneg %p761_p5  ;;  %p594_p9 = scmp.ne.s32.totalorder %s149_s23, %s593_s26 }
   0xc   : > { %p602_p13 = scmp.lt.s32.totalorder %s593_s26, %s593_s26 }
   0xd   : > { %p769_p7 = pnand %p517_p6, %p749_p1 }
   0xe   : > { %p603_p0 = por %p602_p13, %p601_p12 }
   0xf   : > { %p584_p8 = pneg %p769_p7 }
  0x11   : > { %p596_p10 = pnand %p594_p9, %p584_p8 }
  0x13   : > { %p597_p11 = pneg %p596_p10 }
  0x15   : > { %p604_p2 = pnand %p603_p0, %p597_p11 }
  0x17   : > { %607 = shalt.err (!%p604_p2)
}
  0x18   : > { %s693_s27 = smov 128   ;;  %s694_s28 = smov 8  }
  0x19   : > { %520 = dma.hbm_to_vmem [thread:$0]  (!%p769_p7), %s860_s1, 256, %s149_s23, [#allocation5], %s693_s27, %s693_s27, %s694_s28  }
  0x1a   : > { %p32_p3 = scmp.ge.s32.totalorder %s30_s25, 2  ;;  %s39_s4 = sadd.s32 1, %s678_s14 }
  0x1b   : > { %p46_p6 = scmp.ne.s32.totalorder %s678_s14, %s674_s13  ;;  %p47_p8 = scmp.eq.s32.totalorder %s690_s17, 0 }
  0x1c   : > { %s874_s25 = smov (%p32_p3, %s30_s25), 0  ;;  %p526_p10 = scmp.lt.s32.totalorder %s690_s17, 2 }
  0x1d   : > { %p48_p9 = por %p47_p8, %p46_p6  ;;  %s34_s5 = ssub.s32 %s686_s16, %s874_s25 }
  0x1e   : > { %s162_s6 = sand.u32 1, %s678_s14   ;;  %p37_p11 = scmp.eq.s32.totalorder %s34_s5, 0 }
  0x1f   : > { %s490_s7 = sshll.u32 %s162_s6, 5  ;;  %s504_s8 = sshll.u32 %s686_s16, 9 }
  0x20   : > { %s793_s9 = scalar_select %p37_p11, %s678_s14, %s39_s4  }
  0x21   : > { %s174_s12 = scalar_lea.hbm %s859_s0, %s504_s8  ;;  %s166_s18 = scalar_lea.vmem [#allocation2], %s490_s7 }
  0x22   : > { %s175_s22 = sshll.u32 %s166_s18, 4  ;;  %p798_p7 = pnand %p526_p10, %p48_p9  ;;  %s176_s22 = int_to_ptr.vmem [resolvable:$true] %s175_s22 }
  0x23   : > { %s163_s24 = scalar_lea.sflag [#allocation3], %s162_s6  ;;  %s621_s26 = scalar_lea.vmem %s176_s22, 512 }
  0x24   : > { %p610_p12 = pneg %p798_p7  ;;  %p622_p13 = scmp.ne.s32.totalorder %s176_s22, %s621_s26 }
  0x25   : > { %s695_s27 = smov [#allocation2]  }
  0x26   : > { %p624_p0 = pnand %p622_p13, %p610_p12  ;;  %s626_s28 = sshll.u32 %s695_s27, 4  ;;  %s627_s28 = int_to_ptr.vmem [resolvable:$false] %s626_s28 }
  0x27   : > { %s628_s29 = scalar_lea.vmem %s627_s28, 1024  ;;  %p629_p3 = scmp.lt.s32.totalorder %s176_s22, %s627_s28 }
  0x28   : > { %p625_p2 = pneg %p624_p0  ;;  %p630_p6 = scmp.lt.s32.totalorder %s628_s29, %s621_s26 }
  0x2a   : > { %p631_p8 = por %p630_p6, %p629_p3 }
  0x2c   : > { %p632_p9 = pnand %p631_p8, %p625_p2 }
  0x2e   : > { %635 = shalt.err (!%p632_p9)
}
  0x2f   : > { %s696_s30 = smov 256   ;;  %s697_s4 = smov 16  }
  0x30   : > { %524 = dma.hbm_to_vmem [thread:$0]  (!%p798_p7), %s174_s12, 512, %s176_s22, %s163_s24, %s696_s30, %s696_s30, %s697_s4  }
  0x31   : > { %187 = sbr.rel (%p761_p5) target bundleno = 407 (0x197), region = 28  ;;  %s189_s5 = sand.u32 (!%p761_p5), 1, %s674_s13  }
  0x32   : > { %s494_s6 = sshll.u32 (!%p761_p5), %s189_s5, 5  ;;  %s190_s7 = scalar_lea.sflag (!%p761_p5), [#allocation3], %s189_s5 }
  0x33   : > { %s193_s8 = scalar_lea.vmem (!%p761_p5), [#allocation2], %s494_s6 }
  0x36   : > { %661 = dma.done.wait (%p757_p4), %s190_s7, 512  }
  0x37   : > { %663 = vsyncadd (%p757_p4), %s190_s7, 4294966784 }
  0x38   : > { %665 = dma.done.wait (%p749_p1), [#allocation5], 256  }
  0x39   : > { %667 = vsyncadd (%p749_p1), [#allocation5], 4294967040  ;;  %v698_v0 = vmov 0.0   ;;  %v250_v1 = vld [vmem:[%s193_s8 + $0x18] sm:$0xff]  ;;  %v249_v2 = vld [vmem:[%s193_s8 + $0x10] sm:$0xff]  ;;  %vm251_vm0 = vcmask 130048  }
  0x3a   : > { %322 = vmatprep.mubr.f32.mxu0 %v698_v0  ;;  %328 = vmatprep.mubr.f32.mxu1 %v698_v0  ;;  %v248_v3 = vld [vmem:[%s193_s8 + $0x8] sm:$0xff]  ;;  %v247_v4 = vld [vmem:[%s193_s8] sm:$0xff]  ;;  %p226_p1 = scmp.lt.s32.totalorder %s682_s15, 1  ;;  %vm240_vm1 = vcmask 7168  }
  0x3b   : > { %286 = vmatprep.subr.mxu0 %v250_v1  ;;  %507 = vmatprep.subr.mxu1 %v250_v1  ;;  %v245_v5 = vld [vmem:[#allocation4] sm:$0xff]  ;;  %v246_v6 = vld [vmem:[#allocation4 + $0x8] sm:$0xff] }
  0x3c   : > { %287 = vmatpush1.msra.mxu0 %v249_v2  ;;  %509 = vmatpush1.msra.mxu1 %v249_v2  ;;  %s876_s15 = smov (!%p226_p1, %s682_s15), 1 }
  0x3d   : > { %288 = vmatprep.subr.mxu0 %v248_v3  ;;  %508 = vmatprep.subr.mxu1 %v248_v3  ;;  %s505_s19 = sshll.u32 %s876_s15, 4 }
  0x3e   : > { %289 = vmatpush1.msra.mxu0 %v247_v4  ;;  %510 = vmatpush1.msra.mxu1 %v247_v4  ;;  %s822_s10 = scalar_lea.vmem %s861_s2, %s505_s19  ;;  %s235_s12 = scalar_lea.vmem %s862_s3, %s505_s19 }
  0x3f   : > { %500 = vmatmul.mubr.msk.f32.vlgmr.msra.gmra.mxu0 %vm251_vm0, %v245_v5  ;;  %501 = vmatmul.mubr.msk.f32.vlgmr.msra.gmra.mxu1 %vm251_vm0, %v246_v6  ;;  %241 = vst.msk [vmem:[%s822_s10] sm:$0xff] %vm240_vm1, %v698_v0  ;;  %242 = vst.msk [vmem:[%s822_s10 + $0x8] sm:$0xff] %vm240_vm1, %v698_v0 }
  0x40   : > { %243 = vst.msk [vmem:[%s235_s12] sm:$0xff] %vm240_vm1, %v698_v0  ;;  %244 = vst.msk [vmem:[%s235_s12 + $0x8] sm:$0xff] %vm240_vm1, %v698_v0 }
  0x46   : > { %v335_v19 = vld [vmem:[%s822_s10] sm:$0xff]  ;;  %v336_v24 = vld [vmem:[%s822_s10 + $0x8] sm:$0xff] }
  0x47   : > { %v348_v21 = vld [vmem:[%s235_s12] sm:$0xff]  ;;  %v349_v27 = vld [vmem:[%s235_s12 + $0x8] sm:$0xff] }
  0xff   : > { %v324_v7 = vpop.f32.mrf.mxu0  ;;  %v330_v8 = vpop.f32.mrf.mxu1 }
 0x100   : > { %v350_v11 = vmul.f32 %v324_v7, %v324_v7  ;;  %v352_v14 = vmul.f32 %v330_v8, %v330_v8 }
 0x101   : > { %v326_v9 = vpop.f32.mrf.mxu0  ;;  %v332_v10 = vpop.f32.mrf.mxu1 }
 0x102   : > { %v351_v12 = vmul.f32 %v326_v9, %v326_v9  ;;  %v337_v13 = vadd.f32 %v326_v9, %v324_v7  ;;  %v353_v15 = vmul.f32 %v332_v10, %v332_v10  ;;  %v340_v17 = vadd.f32 %v332_v10, %v330_v8 }
 0x104   : > { %338 = vadd.xlane.f32.xlu0 %v337_v13  ;;  %v354_v16 = vadd.f32 %v351_v12, %v350_v11  ;;  %v357_v18 = vadd.f32 %v353_v15, %v352_v14 }
 0x106   : > { %355 = vadd.xlane.f32.xlu1 %v354_v16 }
 0x108   : > { %341 = vadd.xlane.f32.xlu0 %v340_v17 }
 0x10a   : > { %358 = vadd.xlane.f32.xlu1 %v357_v18 }
 0x18d   : > { %v339_v20 = vpop.xlane.xlu0 %338 }
 0x18e   : > { %v343_v22 = vadd.f32 %v339_v20, %v335_v19 }
 0x18f   : > { %v356_v23 = vpop.xlane.xlu1 %355 }
 0x190   : > { %346 = vst.msk [vmem:[%s822_s10] sm:$0xff] %vm240_vm1, %v343_v22  ;;  %v360_v25 = vadd.f32 %v356_v23, %v348_v21 }
 0x191   : > { %v342_v26 = vpop.xlane.xlu0 %341 }
 0x192   : > { %362 = vst.msk [vmem:[%s235_s12] sm:$0xff] %vm240_vm1, %v360_v25  ;;  %v344_v28 = vadd.f32 %v342_v26, %v336_v24 }
 0x193   : > { %v359_v29 = vpop.xlane.xlu1 %358 }
 0x194   : > { %347 = vst.msk [vmem:[%s822_s10 + $0x8] sm:$0xff] %vm240_vm1, %v344_v28  ;;  %v361_v30 = vadd.f32 %v359_v29, %v349_v27 }
 0x196   : > { %363 = vst.msk [vmem:[%s235_s12 + $0x8] sm:$0xff] %vm240_vm1, %v361_v30 }
 0x197 PF: > { %s18_s17 = sadd.s32 1, %s690_s17   ;;  %s868_s12 = smov %s674_s13 }
 0x198   : > { %p15_p4 = scmp.ge.s32.totalorder %s18_s17, 4   ;;  %s869_s13 = smov %s678_s14 }
 0x199   : > { %s870_s14 = smov %s793_s9  ;;  %s871_s15 = smov %s686_s16 }
 0x19a   : > { %s872_s16 = smov %s874_s25  ;;  %17 = sbr.rel (!%p15_p4) target bundleno = 5 (0x5), region = 88 }
 0x19f   :  { %401 = vsyncpa [#allocation3], 1 }
 0x1a0   :  { %403 = vsyncpa [#allocation3 + $0x1], 1 }
 0x1a1   :  { %404 = vsyncpa [#allocation5], 1 }

</bundles_post_ra>
